<compile_context>
chip_gen: v7x
topology: tpu7x:2x2x1
jax: 0.10.0
libtpu: 0.0.40
codegen_flags: <defaults>
</compile_context>

<pallas_src>
import jax
import jax.numpy as jnp
from jax.experimental import pallas as pl
from jax.experimental.pallas import tpu as pltpu


def _round_up(a: int, b: int) -> int:
    return ((a + b - 1) // b) * b


def _cdiv(a: int, b: int) -> int:
    return (a + b - 1) // b


def _vmem_capacity_bytes() -> int:
    """Per-TensorCore VMEM capacity; conservative 64 MiB fallback (v7x)."""
    try:
        cap = getattr(pltpu.get_tpu_info(), "vmem_capacity_bytes", None)
        if cap:
            return int(cap)
    except Exception:
        pass
    return 64 * 1024 * 1024


def _choose_tile(HW, N, C_in, C_mid, C_out, x_itemsize, out_itemsize, vmem_bytes):
    """Largest lane-dense spatial tile (multiple of 128) such that:
      (a) double-buffered x/y blocks + f32 intermediates fit in ~40% of VMEM,
      (b) the grid still has >= ~4 steps so both TCs on v7x megacore get work.
    """
    HW_128 = _round_up(HW, 128)
    per_lane = (2 * C_in * x_itemsize          # double-buffered x block
                + 2 * C_out * out_itemsize     # double-buffered y block
                + (C_mid + C_out) * 4)         # f32 intermediates h and y
    budget = int(0.40 * vmem_bytes)
    vmem_cap = max(128, (budget // per_lane) // 128 * 128)

    min_grid_steps = 4                          # keep >=2 (ideally 4+) grid steps
    tiles_per_batch = max(1, _cdiv(min_grid_steps, N))
    parallel_cap = max(128, _round_up(_cdiv(HW_128, tiles_per_batch), 128))

    return max(128, min(vmem_cap, parallel_cap, HW_128))


def _pointwise_kernel(x_ref, w1_ref, b1_ref, w2_ref, b2_ref, o_ref):
    # x_ref : (1, C_in, T)    activation tile, spatial (H*W) on the lane axis
    # w1_ref: (C_mid, C_in)   conv1 weight (resident across the grid)
    # b1_ref: (C_mid, 1)      conv1 bias, f32
    # w2_ref: (C_out, C_mid)  conv2 weight (resident)
    # b2_ref: (C_out, 1)      conv2 bias, f32
    # o_ref : (1, C_out, T)
    x = x_ref[0]                                                      # (C_in, T)
    h = jnp.dot(w1_ref[...], x, preferred_element_type=jnp.float32)  # (C_mid, T)
    h = jnp.maximum(h + b1_ref[...], 0.0)                             # bias + ReLU (f32)
    y = jnp.dot(w2_ref[...], h.astype(w2_ref.dtype),
                preferred_element_type=jnp.float32)                   # (C_out, T)
    y = y + b2_ref[...] + x.astype(jnp.float32)                       # bias + residual
    o_ref[0] = y.astype(o_ref.dtype)


def pointwise_net(x, w1, b1, w2, b2):
    """Fused PointWiseNet forward: conv2(relu(conv1(x))) + x (1x1 convs, bias).

    x : (N, C_in, H, W)  NCHW activations (f32 or bf16)
    w1: (C_mid, C_in), b1: (C_mid,)   (Conv2d 1x1 weight squeezed to 2-D)
    w2: (C_out, C_mid), b2: (C_out,)
    Returns (N, C_out, H, W), dtype of x.  Residual requires C_out == C_in.
    """
    N, C_in, H, W = x.shape
    C_mid = w1.shape[0]
    C_out = w2.shape[0]
    assert C_out == C_in, "residual `+ x` requires conv2 out_channels == in_channels"
    HW = H * W

    vmem_bytes = _vmem_capacity_bytes()
    x_item = jnp.dtype(x.dtype).itemsize
    out_item = x_item
    tile = _choose_tile(HW, N, C_in, C_mid, C_out, x_item, out_item, vmem_bytes)

    # Pure metadata reshape (contiguous NCHW) -> spatial axis lane-dense.
    # No pad, no transpose, no extra HBM passes; a ragged last block is masked
    # by Pallas at the output boundary (computation is purely per-column).
    x_rows = x.reshape(N, C_in, HW)
    b1c = b1.reshape(C_mid, 1).astype(jnp.float32)   # keep biases f32 (free accuracy)
    b2c = b2.reshape(C_out, 1).astype(jnp.float32)

    grid = (N, _cdiv(HW, tile))

    w_item = jnp.dtype(w1.dtype).itemsize
    cost = pl.CostEstimate(
        flops=2 * N * HW * (C_in * C_mid + C_mid * C_out),
        transcendentals=0,
        bytes_accessed=N * HW * (C_in * x_item + C_out * out_item)
        + (w1.size + w2.size) * w_item + (b1.size + b2.size) * 4,
    )

    out_rows = pl.pallas_call(
        _pointwise_kernel,
        out_shape=jax.ShapeDtypeStruct((N, C_out, HW), x.dtype),
        grid_spec=pltpu.PrefetchScalarGridSpec(
            num_scalar_prefetch=0,
            grid=grid,
            in_specs=[
                pl.BlockSpec((1, C_in, tile), lambda n, t: (n, 0, t)),
                pl.BlockSpec((C_mid, C_in), lambda n, t: (0, 0)),
                pl.BlockSpec((C_mid, 1), lambda n, t: (0, 0)),
                pl.BlockSpec((C_out, C_mid), lambda n, t: (0, 0)),
                pl.BlockSpec((C_out, 1), lambda n, t: (0, 0)),
            ],
            out_specs=pl.BlockSpec((1, C_out, tile), lambda n, t: (n, 0, t)),
        ),
        compiler_params=pltpu.CompilerParams(
            dimension_semantics=("parallel", "parallel"),
            vmem_limit_bytes=int(0.75 * vmem_bytes),
        ),
        cost_estimate=cost,
    )(x_rows, w1, b1c, w2, b2c)

    return out_rows.reshape(N, C_out, H, W)


if __name__ == "__main__":
    # Module dims: dim1 is unused by forward; dim2 = in, dim3 = mid, dim4 = out.
    # forward() adds `+ x`, so dim4 must equal dim2 for the module to be valid.
    dim2, dim3, dim4 = 4, 8, 4
    N, Hs, Ws = 2, 16, 16

    key = jax.random.PRNGKey(0)
    kx, k1, kb1, k2, kb2 = jax.random.split(key, 5)

    x = jax.random.normal(kx, (N, dim2, Hs, Ws), dtype=jnp.float32)
    w1 = jax.random.normal(k1, (dim3, dim2), dtype=jnp.float32) * 0.1
    b1 = jax.random.normal(kb1, (dim3,), dtype=jnp.float32) * 0.1
    w2 = jax.random.normal(k2, (dim4, dim3), dtype=jnp.float32) * 0.1
    b2 = jax.random.normal(kb2, (dim4,), dtype=jnp.float32) * 0.1

    # Pure-JAX reference: 1x1 convs as channel matmuls + bias, ReLU, residual.
    ref_h = jnp.einsum("nchw,oc->nohw", x, w1) + b1[None, :, None, None]
    ref_h = jnp.maximum(ref_h, 0.0)
    ref = jnp.einsum("nchw,oc->nohw", ref_h, w2) + b2[None, :, None, None] + x

    # --- f32 path: tight correctness check ---
    out = jax.block_until_ready(pointwise_net(x, w1, b1, w2, b2))
    assert out.shape == (N, dim4, Hs, Ws)
    assert jnp.allclose(out, ref, atol=1e-4, rtol=1e-4), float(
        jnp.max(jnp.abs(out - ref)))

    # --- bf16 path (halves HBM bytes on this bandwidth-bound op); f32 biases ---
    out_bf16 = jax.block_until_ready(
        pointwise_net(x.astype(jnp.bfloat16),
                      w1.astype(jnp.bfloat16), b1,
                      w2.astype(jnp.bfloat16), b2))
    assert out_bf16.shape == (N, dim4, Hs, Ws)
    assert jnp.allclose(out_bf16.astype(jnp.float32), ref, atol=1.5e-1, rtol=1e-1), float(
        jnp.max(jnp.abs(out_bf16.astype(jnp.float32) - ref)))

    print("KERNEL_OK")
</pallas_src>

<mosaic_0001>
module attributes {stable_mosaic.version = 11 : i64} {
  func.func @_pointwise_kernel(%arg0: i32, %arg1: i32, %arg2: memref<1x4x128xf32, #tpu.memory_space<vmem>>, %arg3: memref<8x4xf32, #tpu.memory_space<vmem>>, %arg4: memref<8x1xf32, #tpu.memory_space<vmem>>, %arg5: memref<4x8xf32, #tpu.memory_space<vmem>>, %arg6: memref<4x1xf32, #tpu.memory_space<vmem>>, %arg7: memref<1x4x128xf32, #tpu.memory_space<vmem>>) attributes {dimension_semantics = [#tpu.dimension_semantics<parallel>, #tpu.dimension_semantics<parallel>], iteration_bounds = array<i64: 2, 2>, scalar_prefetch = 0 : i64, scratch_operands = 0 : i64, tpu.core_type = #tpu.core_type<tc>, window_params = [{transform_indices = @transform_0, window_bounds = array<i64: 1, 4, 128>}, {pipeline_mode = #tpu.pipeline_mode<synchronous>, transform_indices = @transform_1, window_bounds = array<i64: 8, 4>}, {pipeline_mode = #tpu.pipeline_mode<synchronous>, transform_indices = @transform_2, window_bounds = array<i64: 8, 1>}, {pipeline_mode = #tpu.pipeline_mode<synchronous>, transform_indices = @transform_3, window_bounds = array<i64: 4, 8>}, {pipeline_mode = #tpu.pipeline_mode<synchronous>, transform_indices = @transform_4, window_bounds = array<i64: 4, 1>}, {transform_indices = @transform_5, window_bounds = array<i64: 1, 4, 128>}]} {
    %c0 = arith.constant 0 : index
    %c0_0 = arith.constant 0 : index
    %c0_1 = arith.constant 0 : index
    %0 = vector.load %arg2[%c0, %c0_0, %c0_1] : memref<1x4x128xf32, #tpu.memory_space<vmem>>, vector<1x4x128xf32>
    %1 = vector.shape_cast %0 : vector<1x4x128xf32> to vector<4x128xf32>
    %c0_2 = arith.constant 0 : index
    %c0_3 = arith.constant 0 : index
    %2 = vector.load %arg3[%c0_2, %c0_3] : memref<8x4xf32, #tpu.memory_space<vmem>>, vector<8x4xf32>
    %cst = arith.constant dense<0.000000e+00> : vector<8x128xf32>
    %3 = tpu.matmul %2, %1, %cst {dimension_numbers = #tpu.dot_dimension_numbers<[1], [0], [0], [1], [0, 0, 1, 1], [], []>} : vector<8x4xf32>, vector<4x128xf32>, vector<8x128xf32> -> vector<8x128xf32>
    %c0_4 = arith.constant 0 : index
    %c0_5 = arith.constant 0 : index
    %4 = vector.load %arg4[%c0_4, %c0_5] : memref<8x1xf32, #tpu.memory_space<vmem>>, vector<8x1xf32>
    %5 = vector.broadcast %4 : vector<8x1xf32> to vector<8x128xf32>
    %6 = arith.addf %3, %5 : vector<8x128xf32>
    %cst_6 = arith.constant 0.000000e+00 : f32
    %7 = vector.broadcast %cst_6 : f32 to vector<8x128xf32>
    %8 = arith.maximumf %6, %7 : vector<8x128xf32>
    %c0_7 = arith.constant 0 : index
    %c0_8 = arith.constant 0 : index
    %9 = vector.load %arg5[%c0_7, %c0_8] : memref<4x8xf32, #tpu.memory_space<vmem>>, vector<4x8xf32>
    %cst_9 = arith.constant dense<0.000000e+00> : vector<4x128xf32>
    %10 = tpu.matmul %9, %8, %cst_9 {dimension_numbers = #tpu.dot_dimension_numbers<[1], [0], [0], [1], [0, 0, 1, 1], [], []>} : vector<4x8xf32>, vector<8x128xf32>, vector<4x128xf32> -> vector<4x128xf32>
    %c0_10 = arith.constant 0 : index
    %c0_11 = arith.constant 0 : index
    %11 = vector.load %arg6[%c0_10, %c0_11] : memref<4x1xf32, #tpu.memory_space<vmem>>, vector<4x1xf32>
    %12 = vector.broadcast %11 : vector<4x1xf32> to vector<4x128xf32>
    %13 = arith.addf %10, %12 : vector<4x128xf32>
    %14 = arith.addf %13, %1 : vector<4x128xf32>
    %c0_12 = arith.constant 0 : index
    %c0_13 = arith.constant 0 : index
    %c0_14 = arith.constant 0 : index
    %15 = vector.load %arg7[%c0_12, %c0_13, %c0_14] : memref<1x4x128xf32, #tpu.memory_space<vmem>>, vector<1x4x128xf32>
    %16 = vector.shape_cast %15 : vector<1x4x128xf32> to vector<4x128xf32>
    %17 = vector.shape_cast %14 : vector<4x128xf32> to vector<1x4x128xf32>
    tpu.vector_store %arg7[%c0_12, %c0_13, %c0_14], %17 {strides = array<i32>} : memref<1x4x128xf32, #tpu.memory_space<vmem>>, vector<1x4x128xf32>,
    return
  }
  func.func @transform_0(%arg0: i32, %arg1: i32) -> (i32, i32, i32) {
    %c0_i32 = arith.constant 0 : i32
    %c0_i32_0 = arith.constant 0 : i32
    return %arg0, %c0_i32, %arg1 : i32, i32, i32
  }
  func.func @transform_1(%arg0: i32, %arg1: i32) -> (i32, i32) {
    %c0_i32 = arith.constant 0 : i32
    %c0_i32_0 = arith.constant 0 : i32
    %c0_i32_1 = arith.constant 0 : i32
    return %c0_i32, %c0_i32_0 : i32, i32
  }
  func.func @transform_2(%arg0: i32, %arg1: i32) -> (i32, i32) {
    %c0_i32 = arith.constant 0 : i32
    %c0_i32_0 = arith.constant 0 : i32
    %c0_i32_1 = arith.constant 0 : i32
    return %c0_i32, %c0_i32_0 : i32, i32
  }
  func.func @transform_3(%arg0: i32, %arg1: i32) -> (i32, i32) {
    %c0_i32 = arith.constant 0 : i32
    %c0_i32_0 = arith.constant 0 : i32
    %c0_i32_1 = arith.constant 0 : i32
    return %c0_i32, %c0_i32_0 : i32, i32
  }
  func.func @transform_4(%arg0: i32, %arg1: i32) -> (i32, i32) {
    %c0_i32 = arith.constant 0 : i32
    %c0_i32_0 = arith.constant 0 : i32
    %c0_i32_1 = arith.constant 0 : i32
    return %c0_i32, %c0_i32_0 : i32, i32
  }
  func.func @transform_5(%arg0: i32, %arg1: i32) -> (i32, i32, i32) {
    %c0_i32 = arith.constant 0 : i32
    %c0_i32_0 = arith.constant 0 : i32
    return %arg0, %c0_i32, %arg1 : i32, i32, i32
  }
}

</mosaic_0001>

<bundles_post_ra>
// kernel: tpu_custom_call.1
= control target key start
LH: loop header
LB: loop body
LE: loop exit
PB: predicated region body
PF: predicated region fallthrough
CT: control target
= control target key end

     0   :  { %10 = vsyncpa [#allocation3], 0  ;;  %s896_s0 = inlined_call_operand.vmem [shape: f32[2,4,256], index: 0, kind: input, shape index: {}]   ;;  %s897_s1 = inlined_call_operand.vmem [shape: f32[8,4], index: 1, kind: input, shape index: {}]   ;;  %s898_s2 = inlined_call_operand.vmem [shape: f32[8,1], index: 2, kind: input, shape index: {}]   ;;  %s899_s3 = inlined_call_operand.vmem [shape: f32[4,8], index: 3, kind: input, shape index: {}]   ;;  %s900_s4 = inlined_call_operand.vmem [shape: f32[4,1], index: 4, kind: input, shape index: {}]   ;;  %s901_s5 = inlined_call_operand.hbm [shape: f32[2,4,256], index: 5, kind: output, shape index: {}]  }
   0x1   :  { %12 = vsyncpa [#allocation3 + $0x1], 0  ;;  %s747_s18 = smov 0   ;;  %s749_s19 = smov 0  }
   0x2   :  { %s751_s20 = smov 0   ;;  %s753_s21 = smov 0  }
   0x3   :  { %s755_s22 = smov 0   ;;  %s757_s23 = smov 0  }
   0x4   :  { %s759_s24 = smov 0   ;;  %s761_s25 = smov 0  }
   0x5 LB: > { %s512_s26 = sadd.s32 4294967295, %s711_s25   ;;  %s513_s27 = sadd.s32 4294967294, %s711_s25   ;;  %s711_s25 = sphi %s761_s25, %s18_s25   ;;  %s707_s24 = sphi %s759_s24, %s910_s24   ;;  %s703_s23 = sphi %s757_s23, %s909_s23   ;;  %s699_s22 = sphi %s755_s22, %s908_s22   ;;  %s695_s21 = sphi %s753_s21, %s907_s21   ;;  %s691_s20 = sphi %s751_s20, %s906_s20   ;;  %s687_s19 = sphi %s749_s19, %s905_s19   ;;  %s683_s18 = sphi %s747_s18, %s904_s18  }
   0x6   : > { %s27_s28 = sadd.s32 1, %s703_s23  ;;  %s30_s29 = sadd.s32 1, %s707_s24 }
   0x7   : > { %p28_p0 = scmp.ge.s32.totalorder %s27_s28, 2  ;;  %p161_p1 = scmp.ne.s32.totalorder %s691_s20, %s687_s19 }
   0x8   : > { %p162_p2 = scmp.eq.s32.totalorder %s512_s26, 3  ;;  %p167_p5 = scmp.ne.s32.totalorder %s687_s19, %s683_s18 }
   0x9   : > { %s912_s28 = smov (%p28_p0, %s27_s28), 0  ;;  %s914_s29 = smov (!%p28_p0, %s30_s29), %s707_s24 }
   0xa   : > { %s147_s30 = ssub.s32 %s703_s23, %s912_s28  ;;  %p798_p3 = por %p162_p2, %p161_p1 }
   0xb   : > { %p32_p4 = scmp.ge.s32.totalorder %s914_s29, 2  ;;  %p168_p6 = scmp.eq.s32.totalorder %s513_s27, 3 }
   0xc   : > { %p516_p7 = scmp.ge.s32.totalorder %s711_s25, 1  ;;  %p209_p9 = scmp.lt.s32.totalorder %s711_s25, 5 }
   0xd   : > { %s916_s29 = smov (%p32_p4, %s914_s29), 0  ;;  %p807_p8 = por %p168_p6, %p167_p5 }
   0xe   : > { %s146_s8 = ssub.s32 %s707_s24, %s916_s29  ;;  %s151_s9 = sadd.s32 1, %s691_s20 }
   0xf   : > { %s148_s10 = sor.u32 %s147_s30, %s146_s8  ;;  %p210_p10 = pnand %p516_p7, %p209_p9 }
  0x10   : > { %p149_p11 = scmp.eq.s32.totalorder %s148_s10, 0  ;;  %p240_p12 = scmp.lt.s32.totalorder (!%p210_p10), %s699_s22, 1  ;;  %v713_v0 = vmov (!%p210_p10), 0.0   ;;  %vm714_vm0 = vmmov (!%p210_p10), 0   ;;  %v250_v1 = vld [vmem:[%s898_s2] sm:$0xff] (!%p210_p10)  ;;  %v715_v2 = vmov (!%p210_p10), 0  }
  0x11   : > { %213 = sbr.rel (%p210_p10) target bundleno = 479 (0x1df), region = 40  ;;  %p242_p13 = scmp.lt.s32.totalorder (!%p210_p10), %s695_s21, 1  ;;  %532 = vmatprep.subr.mxu0 (!%p210_p10), %v713_v0  ;;  %534 = vmatprep.mubr.msk.f32.mxu0 (!%p210_p10), %vm714_vm0, %v713_v0  ;;  %v336_v3 = vld [vmem:[%s900_s4] sm:$0xf] (!%p210_p10)  ;;  %vm260_vm1 = vcmask (!%p210_p10), 1043456   ;;  %vm256_vm2 = vcmask (!%p210_p10), 31744  }
  0x12   : > { %s816_s11 = scalar_select %p149_p11, %s691_s20, %s151_s9  }
  0x13   : > { %616 = vset.pattern.permute.xlu0 (!%p210_p10), %v715_v2  ;;  %537 = vmatprep.subr.mxu1 (!%p210_p10), %v713_v0  ;;  %v249_v4 = vld [vmem:[%s897_s1] sm:$0xff] (!%p210_p10)  ;;  %vm342_vm3 = vcmask (!%p210_p10), 64512   ;;  %s524_s26 = sshll.u32 (!%p210_p10), %s699_s22, 1 }
  0x14   : > { %253 = vperm.xlu0 (!%p210_p10), %616, %v250_v1   ;;  %539 = vmatprep.mubr.msk.f32.mxu1 (!%p210_p10), %vm714_vm0, %v713_v0  ;;  %v335_v11 = vld [vmem:[%s899_s3] sm:$0xf] (!%p210_p10) }
  0x18   : > { %s241_s14 = scalar_select %p240_p12, %s699_s22, 1  ;;  %339 = vperm.xlu0 %616, %v336_v3  }
  0x19   : > { %s243_s15 = scalar_select %p242_p13, %s695_s21, 1 }
  0x1a   : > { %s518_s16 = sshll.u32 %s241_s14, 1  ;;  %s716_s14 = smov [#allocation2]  }
  0x1b   : > { %s245_s27 = sadd.s32 %s518_s16, %s243_s15  ;;  %s237_s16 = sand.u32 1, %s687_s19  }
  0x1c   : > { %s519_s30 = sshll.u32 %s245_s27, 2  ;;  %s517_s17 = sshll.u32 %s237_s16, 2 }
  0x1d   : > { %s247_s10 = scalar_lea.vmem %s896_s0, %s519_s30  ;;  %s430_s27 = sadd.s32 %s695_s21, %s524_s26 }
  0x1e   : > { %v248_v5 = vld [vmem:[%s247_s10] sm:$0xf]  ;;  %s525_s30 = sshll.u32 %s430_s27, 6  ;;  %s239_s8 = scalar_lea.vmem [#allocation2], %s517_s17 }
  0x1f   : > { %533 = vmatpush3.msk.msra.mxu0 %vm260_vm1, %v248_v5  ;;  %s434_s9 = sshll.u32 %s239_s8, 4  ;;  %s843_s13 = scalar_lea.hbm %s901_s5, %s525_s30  ;;  %s845_s9 = int_to_ptr.vmem [resolvable:$true] %s434_s9 }
  0x20   : > { %535 = vmatmul.mubr.msk.f32.vlgmr.msra.gmra.mrb[0].mxu0 %vm256_vm2, %v249_v4  ;;  %s419_s21 = scalar_lea.sflag [#allocation3], %s237_s16  ;;  %s617_s22 = scalar_lea.vmem %s845_s9, 64 }
  0x21   : > { %p618_p0 = scmp.ne.s32.totalorder %s845_s9, %s617_s22  ;;  %s621_s15 = sshll.u32 %s716_s14, 4  ;;  %s622_s15 = int_to_ptr.vmem [resolvable:$false] %s621_s15 }
  0x22   : > { %s623_s17 = scalar_lea.vmem %s622_s15, 128  ;;  %p624_p4 = scmp.lt.s32.totalorder %s845_s9, %s622_s15 }
  0x23   : > { %p619_p1 = pnand %p618_p0, %p798_p3  ;;  %p625_p5 = scmp.lt.s32.totalorder %s623_s17, %s617_s22 }
  0x25   : > { %p620_p2 = pneg %p619_p1  ;;  %p626_p6 = por %p625_p5, %p624_p4 }
  0x27   : > { %p627_p7 = pnand %p626_p6, %p620_p2 }
  0x93   : > { %v254_v6 = vpop.permute.xlu0 %253 }
  0x97   : > { %v340_v12 = vpop.permute.xlu0 %339 }
  0xf3   : > { %v330_v7 = vpop.f32.mrb[0].mxu0 }
  0xf4   : > { %v331_v8 = vadd.f32 %v330_v7, %v254_v6  ;;  %v536_v9 = vpop.f32.mrb[1].mxu0 }
  0xf6   : > { %v334_v10 = vmax.f32 %v331_v8, 0.0 }
  0xf8   : > { %538 = vmatpush3.msra.mxu1 %v334_v10 }
  0xf9   : > { %540 = vmatmul.mubr.msk.f32.vlgmr.msra.gmra.mrb[0].mxu1 %vm342_vm3, %v335_v11 }
 0x1cc   : > { %v412_v13 = vpop.f32.mrb[0].mxu1 }
 0x1cd   : > { %v413_v14 = vadd.f32 %v412_v13, %v340_v12  ;;  %v541_v15 = vpop.f32.mrb[1].mxu1 }
 0x1cf   : > { %v416_v16 = vadd.f32 %v413_v14, %v248_v5 }
 0x1d1   : > { %417 = vst [vmem:[%s239_s8] sm:$0xf] %v416_v16 }
 0x1d2   : > { %630 = shalt.err (!%p627_p7)
}
 0x1d3   : > { %s631_s16 = scalar_lea.hbm %s843_s13, 64  ;;  %s635_s30 = scalar_lea.hbm %s901_s5, 256 }
 0x1d4   : > { %p632_p9 = scmp.ne.s32.totalorder %s843_s13, %s631_s16  ;;  %p636_p12 = scmp.lt.u32.totalorder %s843_s13, %s901_s5 }
 0x1d5   : > { %p637_p13 = scmp.lt.u32.totalorder %s635_s30, %s631_s16  ;;  %p639_p1 = scmp.lt.u32.totalorder %s631_s16, %s843_s13 }
 0x1d6   : > { %p633_p10 = pnand %p632_p9, %p798_p3 }
 0x1d7   : > { %p638_p0 = por %p637_p13, %p636_p12 }
 0x1d8   : > { %p634_p11 = pneg %p633_p10 }
 0x1d9   : > { %p640_p2 = por %p639_p1, %p638_p0 }
 0x1db   : > { %p641_p4 = pnand %p640_p2, %p634_p11 }
 0x1dd   : > { %644 = shalt.err (!%p641_p4)
}
 0x1de   : > { %542 = dma.vmem_to_hbm [thread:$0]  (%p798_p3), %s845_s9, 64, %s843_s13, %s419_s21  }
 0x1df PF: > { %p548_p5 = scmp.ge.s32.totalorder %s711_s25, 2  ;;  %s446_s12 = sand.u32 1, %s683_s18  }
 0x1e0   : > { %s447_s22 = scalar_lea.sflag [#allocation3], %s446_s12 }
 0x1e1   : > { %p545_p6 = pnand %p548_p5, %p807_p8 }
 0x1e3   : > { %678 = dma.done.wait (!%p545_p6), %s447_s22, 64  }
 0x1e4   : > { %680 = vsyncadd (!%p545_p6), %s447_s22, 4294967232  ;;  %s18_s25 = sadd.s32 1, %s711_s25   ;;  %s904_s18 = smov %s687_s19 }
 0x1e5   : > { %p15_p7 = scmp.ge.s32.totalorder %s18_s25, 6   ;;  %s905_s19 = smov %s691_s20 }
 0x1e6   : > { %s906_s20 = smov %s816_s11  ;;  %s907_s21 = smov %s703_s23 }
 0x1e7   : > { %s908_s22 = smov %s707_s24  ;;  %s909_s23 = smov %s912_s28 }
 0x1e8   : > { %s910_s24 = smov %s916_s29  ;;  %17 = sbr.rel (!%p15_p7) target bundleno = 5 (0x5), region = 75 }
 0x1ef   :  { %452 = vsyncpa [#allocation3], 1 }
 0x1f0   :  { %454 = vsyncpa [#allocation3 + $0x1], 1 }

</bundles_post_ra>
